<compile_context>
chip_gen: v6e
topology: v6e:2x2x1
jax: 0.10.0
libtpu: 0.0.40
codegen_flags: <defaults>
</compile_context>

<pallas_src>
import functools

import jax
import jax.numpy as jnp
from jax.experimental import pallas as pl
from jax.experimental.pallas import tpu as pltpu


# ----------------------------- Pallas kernel ------------------------------ #
def _mlp_kernel(xT_ref, w1_ref, b1_ref, w2_ref, b2_ref, w3_ref, b3_ref, q_ref):
    # Batch-on-lanes layout (batch is the fast/lane axis everywhere):
    # xT: (D_in, TB) f32     w1: (H, D_in) bf16    b1: (H, 1) f32
    # h1: (H, TB)    f32     w2: (H, H)    bf16    b2: (H, 1) f32
    # h2: (H, TB)    f32     w3: (H, 1)    f32     b3: (1, 1) f32 (SMEM)
    # q : (1, TB)    f32  -- lane-dense output block
    xT = xT_ref[...].astype(jnp.bfloat16)          # in-kernel cast (VPU slack)

    h1 = jnp.dot(w1_ref[...], xT,
                 preferred_element_type=jnp.float32) + b1_ref[...]
    h1 = jnp.maximum(h1, 0.0)

    h2 = jnp.dot(w2_ref[...], h1.astype(jnp.bfloat16),
                 preferred_element_type=jnp.float32) + b2_ref[...]
    h2 = jnp.maximum(h2, 0.0)

    # fc3 (out_dim = 1): VPU multiply + XLU sublane (H-axis) reduction instead
    # of an M=1 MXU matmul.
    q = jnp.sum(h2 * w3_ref[...], axis=0, keepdims=True) + b3_ref[0, 0]
    q_ref[...] = q.astype(q_ref.dtype)


# ------------------------------- wrapper ----------------------------------- #
def _round_up(x, m):
    return ((x + m - 1) // m) * m


@functools.partial(jax.jit, static_argnames=("block_b",))
def mlp_forward(x, w1, b1, w2, b2, w3, b3, *, block_b=2048):
    """Fused MLP forward.

    x:  (B, D_in) f32
    w1: (H, D_in) f32   b1: (H, 1) f32         (PyTorch (out, in) layout)
    w2: (H, H)    f32   b2: (H, 1) f32
    w3: (H, 1)    f32   b3: (1, 1) f32
    returns q: (B, 1) f32
    """
    B, d_in = x.shape
    h = w1.shape[0]

    # Fewest grid steps; batch tile a multiple of the 128-lane vreg width.
    num_tiles = pl.cdiv(B, block_b)
    tb = _round_up(pl.cdiv(B, num_tiles), 128)
    b_pad = _round_up(B, tb)
    grid = (b_pad // tb,)

    # Batch on lanes: transpose once in the wrapper; pad the (lane) batch axis.
    xT = x.T                                       # (D_in, B) f32
    if b_pad != B:
        xT = jnp.pad(xT, ((0, 0), (0, b_pad - B)))

    # bf16 matmul weights (one-time tiny casts); f32 accumulation in-kernel.
    w1_bf = w1.astype(jnp.bfloat16)
    w2_bf = w2.astype(jnp.bfloat16)

    q = pl.pallas_call(
        _mlp_kernel,
        out_shape=jax.ShapeDtypeStruct((1, b_pad), jnp.float32),
        grid_spec=pltpu.PrefetchScalarGridSpec(
            num_scalar_prefetch=0,
            grid=grid,
            in_specs=[
                pl.BlockSpec((d_in, tb), lambda i: (0, i)),  # x tile (pipelined)
                pl.BlockSpec((h, d_in), lambda i: (0, 0)),   # w1 (resident)
                pl.BlockSpec((h, 1), lambda i: (0, 0)),      # b1 (resident)
                pl.BlockSpec((h, h), lambda i: (0, 0)),      # w2 (resident)
                pl.BlockSpec((h, 1), lambda i: (0, 0)),      # b2 (resident)
                pl.BlockSpec((h, 1), lambda i: (0, 0)),      # w3 (resident)
                pl.BlockSpec(memory_space=pltpu.MemorySpace.SMEM),  # b3 scalar
            ],
            out_specs=pl.BlockSpec((1, tb), lambda i: (0, i)),  # lane-dense q
        ),
        compiler_params=pltpu.CompilerParams(
            # TODO(synk): switch to pltpu.CORE_PARALLEL on v7x (2 TCs) when the
            # grid has >= 2 steps; plain "parallel" is portable across v5e/v6e.
            dimension_semantics=("parallel",),
            vmem_limit_bytes=32 * 1024 * 1024,
        ),
    )(xT, w1_bf, b1, w2_bf, b2, w3, b3)

    return q[0, :B][:, None]


# ------------------------- parameter setup (glue) -------------------------- #
def init_linear(key, in_features, out_features):
    """PyTorch-style nn.Linear init, deterministic."""
    kw, kb = jax.random.split(key)
    bound = 1.0 / jnp.sqrt(jnp.float32(in_features))
    w = jax.random.uniform(kw, (out_features, in_features), jnp.float32,
                           minval=-bound, maxval=bound)
    b = jax.random.uniform(kb, (out_features,), jnp.float32,
                           minval=-bound, maxval=bound)
    return w, b


def spectral_normalize(w, key, n_power_iterations=1, eps=1e-12):
    """Deterministic analogue of torch spectral_norm: divide W (out, in) by its
    top singular value estimated via power iteration (u seeded from `key`)."""
    n_power_iterations = max(1, n_power_iterations)
    out_f, _ = w.shape
    u = jax.random.normal(key, (out_f,), jnp.float32)
    u = u / (jnp.linalg.norm(u) + eps)
    v = w.T @ u
    v = v / (jnp.linalg.norm(v) + eps)
    for _ in range(n_power_iterations):
        v = w.T @ u
        v = v / (jnp.linalg.norm(v) + eps)
        u = w @ v
        u = u / (jnp.linalg.norm(u) + eps)
    sigma = u @ (w @ v)
    return w / sigma


class Args:
    hidden_dim = 32
    spectral_regularization = False    # pytorch_spectral_utils path not available
    critic_spectral = "nnn"            # set a position to 'y' to spectral-norm that layer


def build_params(key, input_shape, args):
    k1, k2, k3, ks1, ks2, ks3 = jax.random.split(key, 6)
    w1, b1 = init_linear(k1, input_shape, args.hidden_dim)
    w2, b2 = init_linear(k2, args.hidden_dim, args.hidden_dim)
    w3, b3 = init_linear(k3, args.hidden_dim, 1)
    if args.critic_spectral[0] == "y":
        w1 = spectral_normalize(w1, ks1)
    if args.critic_spectral[1] == "y":
        w2 = spectral_normalize(w2, ks2)
    if args.critic_spectral[2] == "y":
        w3 = spectral_normalize(w3, ks3)
    # Kernel layout: W in PyTorch (out, in); biases as (out, 1) columns;
    # w3 as an (H, 1) column; b3 as a (1, 1) SMEM scalar.
    return (w1, b1[:, None], w2, b2[:, None], w3.T, b3[None, :])


def reference_forward(x, w1, b1, w2, b2, w3, b3):
    """Plain-JAX reference in the same mixed precision as the kernel."""
    x_bf = x.astype(jnp.bfloat16)
    h1 = jnp.maximum(
        jnp.dot(x_bf, w1.astype(jnp.bfloat16).T,
                preferred_element_type=jnp.float32) + b1[:, 0], 0.0)
    h2 = jnp.maximum(
        jnp.dot(h1.astype(jnp.bfloat16), w2.astype(jnp.bfloat16).T,
                preferred_element_type=jnp.float32) + b2[:, 0], 0.0)
    return h2 @ w3 + b3[0, 0]


# --------------------------------- main ------------------------------------ #
if __name__ == "__main__":
    args = Args()
    input_shape = 16          # flattened critic input features
    batch = 2

    key = jax.random.PRNGKey(0)
    kx, kx2, kp = jax.random.split(key, 3)
    params = build_params(kp, input_shape, args)

    # Tiny-batch case (matches the module's critic usage).
    x = jax.random.normal(kx, (batch, input_shape), jnp.float32)
    q = jax.block_until_ready(mlp_forward(x, *params))
    q_ref = reference_forward(x, *params)
    assert q.shape == (batch, 1)
    assert jnp.allclose(q, q_ref, atol=1e-4, rtol=1e-4), "mismatch (B=2)"

    # Larger batch exercising the tiled grid + tail padding path.
    big_b = 1000
    xb = jax.random.normal(kx2, (big_b, input_shape), jnp.float32)
    qb = jax.block_until_ready(mlp_forward(xb, *params))
    qb_ref = reference_forward(xb, *params)
    assert qb.shape == (big_b, 1)
    assert jnp.allclose(qb, qb_ref, atol=1e-4, rtol=1e-4), "mismatch (B=1000)"

    print("KERNEL_OK")
</pallas_src>

<mosaic_0001>
module attributes {stable_mosaic.version = 11 : i64} {
  func.func @_mlp_kernel(%arg0: i32, %arg1: memref<16x128xf32, #tpu.memory_space<vmem>>, %arg2: memref<32x16xbf16, #tpu.memory_space<vmem>>, %arg3: memref<32x1xf32, #tpu.memory_space<vmem>>, %arg4: memref<32x32xbf16, #tpu.memory_space<vmem>>, %arg5: memref<32x1xf32, #tpu.memory_space<vmem>>, %arg6: memref<32x1xf32, #tpu.memory_space<vmem>>, %arg7: memref<1x1xf32, #tpu.memory_space<smem>>, %arg8: memref<1x128xf32, #tpu.memory_space<vmem>>) attributes {dimension_semantics = [#tpu.dimension_semantics<parallel>], iteration_bounds = array<i64: 1>, scalar_prefetch = 0 : i64, scratch_operands = 0 : i64, tpu.core_type = #tpu.core_type<tc>, window_params = [{transform_indices = @transform_0, window_bounds = array<i64: 16, 128>}, {pipeline_mode = #tpu.pipeline_mode<synchronous>, transform_indices = @transform_1, window_bounds = array<i64: 32, 16>}, {pipeline_mode = #tpu.pipeline_mode<synchronous>, transform_indices = @transform_2, window_bounds = array<i64: 32, 1>}, {pipeline_mode = #tpu.pipeline_mode<synchronous>, transform_indices = @transform_3, window_bounds = array<i64: 32, 32>}, {pipeline_mode = #tpu.pipeline_mode<synchronous>, transform_indices = @transform_4, window_bounds = array<i64: 32, 1>}, {pipeline_mode = #tpu.pipeline_mode<synchronous>, transform_indices = @transform_5, window_bounds = array<i64: 32, 1>}, {transform_indices = @transform_6, window_bounds = array<i64: 1, 1>}, {transform_indices = @transform_7, window_bounds = array<i64: 1, 128>}]} {
    %c0 = arith.constant 0 : index
    %c0_0 = arith.constant 0 : index
    %0 = vector.load %arg1[%c0, %c0_0] : memref<16x128xf32, #tpu.memory_space<vmem>>, vector<16x128xf32>
    %1 = arith.truncf %0 : vector<16x128xf32> to vector<16x128xbf16>
    %c0_1 = arith.constant 0 : index
    %c0_2 = arith.constant 0 : index
    %2 = vector.load %arg2[%c0_1, %c0_2] : memref<32x16xbf16, #tpu.memory_space<vmem>>, vector<32x16xbf16>
    %cst = arith.constant dense<0.000000e+00> : vector<32x128xf32>
    %3 = tpu.matmul %2, %1, %cst {dimension_numbers = #tpu.dot_dimension_numbers<[1], [0], [0], [1], [0, 0, 1, 1], [], []>} : vector<32x16xbf16>, vector<16x128xbf16>, vector<32x128xf32> -> vector<32x128xf32>
    %c0_3 = arith.constant 0 : index
    %c0_4 = arith.constant 0 : index
    %4 = vector.load %arg3[%c0_3, %c0_4] : memref<32x1xf32, #tpu.memory_space<vmem>>, vector<32x1xf32>
    %5 = vector.broadcast %4 : vector<32x1xf32> to vector<32x128xf32>
    %6 = arith.addf %3, %5 : vector<32x128xf32>
    %cst_5 = arith.constant 0.000000e+00 : f32
    %7 = vector.broadcast %cst_5 : f32 to vector<32x128xf32>
    %8 = arith.maximumf %6, %7 : vector<32x128xf32>
    %c0_6 = arith.constant 0 : index
    %c0_7 = arith.constant 0 : index
    %9 = vector.load %arg4[%c0_6, %c0_7] : memref<32x32xbf16, #tpu.memory_space<vmem>>, vector<32x32xbf16>
    %10 = arith.truncf %8 : vector<32x128xf32> to vector<32x128xbf16>
    %cst_8 = arith.constant dense<0.000000e+00> : vector<32x128xf32>
    %11 = tpu.matmul %9, %10, %cst_8 {dimension_numbers = #tpu.dot_dimension_numbers<[1], [0], [0], [1], [0, 0, 1, 1], [], []>} : vector<32x32xbf16>, vector<32x128xbf16>, vector<32x128xf32> -> vector<32x128xf32>
    %c0_9 = arith.constant 0 : index
    %c0_10 = arith.constant 0 : index
    %12 = vector.load %arg5[%c0_9, %c0_10] : memref<32x1xf32, #tpu.memory_space<vmem>>, vector<32x1xf32>
    %13 = vector.broadcast %12 : vector<32x1xf32> to vector<32x128xf32>
    %14 = arith.addf %11, %13 : vector<32x128xf32>
    %cst_11 = arith.constant 0.000000e+00 : f32
    %15 = vector.broadcast %cst_11 : f32 to vector<32x128xf32>
    %16 = arith.maximumf %14, %15 : vector<32x128xf32>
    %c0_12 = arith.constant 0 : index
    %c0_13 = arith.constant 0 : index
    %17 = vector.load %arg6[%c0_12, %c0_13] : memref<32x1xf32, #tpu.memory_space<vmem>>, vector<32x1xf32>
    %18 = vector.broadcast %17 : vector<32x1xf32> to vector<32x128xf32>
    %19 = arith.mulf %16, %18 : vector<32x128xf32>
    %cst_14 = arith.constant dense<0.000000e+00> : vector<128xf32>
    %20 = vector.multi_reduction <add>, %19, %cst_14 [0] : vector<32x128xf32> to vector<128xf32>
    %21 = vector.shape_cast %20 : vector<128xf32> to vector<1x128xf32>
    %c0_15 = arith.constant 0 : index
    %c0_16 = arith.constant 0 : index
    %22 = memref.load %arg7[%c0_15, %c0_16] : memref<1x1xf32, #tpu.memory_space<smem>>
    %23 = vector.broadcast %22 : f32 to vector<1x128xf32>
    %24 = arith.addf %21, %23 : vector<1x128xf32>
    %c0_17 = arith.constant 0 : index
    %c0_18 = arith.constant 0 : index
    %25 = vector.load %arg8[%c0_17, %c0_18] : memref<1x128xf32, #tpu.memory_space<vmem>>, vector<1x128xf32>
    tpu.vector_store %arg8[%c0_17, %c0_18], %24 {strides = array<i32>} : memref<1x128xf32, #tpu.memory_space<vmem>>, vector<1x128xf32>,
    return
  }
  func.func @transform_0(%arg0: i32) -> (i32, i32) {
    %c0_i32 = arith.constant 0 : i32
    %c0_i32_0 = arith.constant 0 : i32
    return %c0_i32, %arg0 : i32, i32
  }
  func.func @transform_1(%arg0: i32) -> (i32, i32) {
    %c0_i32 = arith.constant 0 : i32
    %c0_i32_0 = arith.constant 0 : i32
    %c0_i32_1 = arith.constant 0 : i32
    return %c0_i32, %c0_i32_0 : i32, i32
  }
  func.func @transform_2(%arg0: i32) -> (i32, i32) {
    %c0_i32 = arith.constant 0 : i32
    %c0_i32_0 = arith.constant 0 : i32
    %c0_i32_1 = arith.constant 0 : i32
    return %c0_i32, %c0_i32_0 : i32, i32
  }
  func.func @transform_3(%arg0: i32) -> (i32, i32) {
    %c0_i32 = arith.constant 0 : i32
    %c0_i32_0 = arith.constant 0 : i32
    %c0_i32_1 = arith.constant 0 : i32
    return %c0_i32, %c0_i32_0 : i32, i32
  }
  func.func @transform_4(%arg0: i32) -> (i32, i32) {
    %c0_i32 = arith.constant 0 : i32
    %c0_i32_0 = arith.constant 0 : i32
    %c0_i32_1 = arith.constant 0 : i32
    return %c0_i32, %c0_i32_0 : i32, i32
  }
  func.func @transform_5(%arg0: i32) -> (i32, i32) {
    %c0_i32 = arith.constant 0 : i32
    %c0_i32_0 = arith.constant 0 : i32
    %c0_i32_1 = arith.constant 0 : i32
    return %c0_i32, %c0_i32_0 : i32, i32
  }
  func.func @transform_6(%arg0: i32) -> (i32, i32) {
    %c0_i32 = arith.constant 0 : i32
    %c0_i32_0 = arith.constant 0 : i32
    %c0_i32_1 = arith.constant 0 : i32
    return %c0_i32, %c0_i32_0 : i32, i32
  }
  func.func @transform_7(%arg0: i32) -> (i32, i32) {
    %c0_i32 = arith.constant 0 : i32
    %c0_i32_0 = arith.constant 0 : i32
    return %c0_i32, %arg0 : i32, i32
  }
}

</mosaic_0001>

<bundles_post_ra>
// kernel: mlp_forward.1
= control target key start
LH: loop header
LB: loop body
LE: loop exit
PB: predicated region body
PF: predicated region fallthrough
CT: control target
= control target key end

     0   :  { %vm69_vm0 = vcmask 130048   ;;  %v310_v2 = vmov 0   ;;  %vm169_vm1 = vcmask 261120   ;;  %s415_s0 = inlined_call_operand.vmem [shape: f32[16,128], index: 0, kind: input, shape index: {}]   ;;  %s416_s1 = inlined_call_operand.vmem [shape: bf16[32,16], index: 1, kind: input, shape index: {}]   ;;  %s417_s2 = inlined_call_operand.vmem [shape: f32[32,1], index: 2, kind: input, shape index: {}]   ;;  %s418_s4 = inlined_call_operand.vmem [shape: f32[32,1], index: 4, kind: input, shape index: {}]   ;;  %s419_s5 = inlined_call_operand.vmem [shape: f32[32,1], index: 5, kind: input, shape index: {}]   ;;  %s420_s3 = inlined_call_operand.vmem [shape: bf16[32,32], index: 3, kind: input, shape index: {}]   ;;  %s421_s6 = inlined_call_operand.<no memory space> [shape: f32[1,1], index: 6, kind: input, shape index: {}]   ;;  %s422_s7 = inlined_call_operand.vmem [shape: f32[1,128], index: 7, kind: output, shape index: {}]  }
   0x1   :  { %v28_v0 = vld [vmem:[%s415_s0] sm:$0xff]  ;;  %v29_v1 = vld [vmem:[%s415_s0 + $0x8] sm:$0xff]  ;;  %304 = vset.pattern.permute.xlu0 %v310_v2  ;;  %305 = vset.pattern.permute.xlu1 %v310_v2  ;;  %v37_v5 = vld [vmem:[%s417_s2 + $0x10] sm:$0xff] }
   0x2   :  { %v30_v3 = vpack.c.bf16 %v29_v1, %v28_v0  ;;  %v306_v4 = vld [vmem:[%s416_s1] sm:$0xff]   ;;  %v307_v6 = vld [vmem:[%s416_s1 + $0x8] sm:$0xff]   ;;  %51 = vperm.xlu0 %304, %v37_v5   ;;  %v38_v8 = vld [vmem:[%s417_s2 + $0x18] sm:$0xff] }
   0x3   :  { %291 = vmatprep.mubr.msk.bf16.mxu0 %vm69_vm0, %v306_v4  ;;  %v35_v7 = vld [vmem:[%s417_s2] sm:$0xff]  ;;  %v36_v9 = vld [vmem:[%s417_s2 + $0x8] sm:$0xff]  ;;  %v137_v12 = vld [vmem:[%s418_s4 + $0x10] sm:$0xff] }
   0x4   :  { %289 = vmatprep.subr.bf16.mxu0 %v30_v3  ;;  %41 = vperm.xlu1 %305, %v35_v7   ;;  %v135_v10 = vld [vmem:[%s418_s4] sm:$0xff]  ;;  %v136_v11 = vld [vmem:[%s418_s4 + $0x8] sm:$0xff]  ;;  %v138_v13 = vld [vmem:[%s418_s4 + $0x18] sm:$0xff] }
   0x5   :  { %290 = vmatpush3.bf16.msra.mxu0 %v30_v3  ;;  %v229_v14 = vld [vmem:[%s419_s5] sm:$0xff]  ;;  %v230_v15 = vld [vmem:[%s419_s5 + $0x8] sm:$0xff]  ;;  %v231_v16 = vld [vmem:[%s419_s5 + $0x10] sm:$0xff] }
   0x6   :  { %56 = vperm.xlu0 %304, %v38_v8   ;;  %v232_v17 = vld [vmem:[%s419_s5 + $0x18] sm:$0xff]  ;;  %v308_v18 = vld [vmem:[%s420_s3] sm:$0xff]   ;;  %v309_v37 = vld [vmem:[%s420_s3 + $0x8] sm:$0xff]  }
   0x7   :  { %299 = vmatprep.mubr.msk.bf16.mxu1 %vm169_vm1, %v308_v18 }
   0x8   :  { %292 = vmatmul.mubr.msk.bf16.vlgmr.msra.gmra.mxu0 %vm69_vm0, %v307_v6  ;;  %46 = vperm.xlu1 %305, %v36_v9   ;;  %v267_v6 = vstv %s421_s6 }
   0xa   :  { %141 = vperm.xlu0 %304, %v135_v10  }
   0xc   :  { %146 = vperm.xlu1 %305, %v136_v11  }
   0xe   :  { %151 = vperm.xlu0 %304, %v137_v12  }
  0x10   :  { %156 = vperm.xlu1 %305, %v138_v13  }
  0x12   :  { %235 = vperm.xlu0 %304, %v229_v14  }
  0x14   :  { %240 = vperm.xlu1 %305, %v230_v15  }
  0x16   :  { %245 = vperm.xlu0 %304, %v231_v16  }
  0x18   :  { %250 = vperm.xlu1 %305, %v232_v17  }
  0x7d   :  { %v52_v19 = vpop.permute.xlu0 %51 }
  0x7f   :  { %v42_v20 = vpop.permute.xlu1 %41 }
  0x81   :  { %v57_v24 = vpop.permute.xlu0 %56 }
  0x83   :  { %v47_v28 = vpop.permute.xlu1 %46 }
  0x85   :  { %v142_v38 = vpop.permute.xlu0 %141 }
  0x87   :  { %v147_v39 = vpop.permute.xlu1 %146 }
  0x89   :  { %v152_v40 = vpop.permute.xlu0 %151 }
  0x8b   :  { %v157_v42 = vpop.permute.xlu1 %156 }
  0x8d   :  { %v236_v47 = vpop.permute.xlu0 %235 }
  0x8f   :  { %v241_v52 = vpop.permute.xlu1 %240 }
  0x91   :  { %v246_v58 = vpop.permute.xlu0 %245 }
  0x93   :  { %v251_v61 = vpop.permute.xlu1 %250 }
  0xc8   :  { %v293_v21 = vpop.f32.mrf.mxu0 }
  0xc9   :  { %v119_v23 = vadd.f32 %v293_v21, %v52_v19 }
  0xca   :  { %v110_v22 = vpop.f32.mrf.mxu0 }
  0xcb   :  { %v111_v26 = vadd.f32 %v110_v22, %v42_v20  ;;  %v127_v30 = vmax.f32 %v119_v23, 0.0 }
  0xcc   :  { %v294_v25 = vpop.f32.mrf.mxu0 }
  0xcd   :  { %v122_v27 = vadd.f32 %v294_v25, %v57_v24  ;;  %v125_v33 = vmax.f32 %v111_v26, 0.0 }
  0xce   :  { %v113_v29 = vpop.f32.mrf.mxu0 }
  0xcf   :  { %v128_v31 = vmax.f32 %v122_v27, 0.0  ;;  %v114_v32 = vadd.f32 %v113_v29, %v47_v28 }
  0xd1   :  { %v126_v34 = vmax.f32 %v114_v32, 0.0  ;;  %v134_v35 = vpack.c.bf16 %v128_v31, %v127_v30 }
  0xd3   :  { %v133_v36 = vpack.c.bf16 %v126_v34, %v125_v33  ;;  %295 = vmatprep.subr.bf16.mxu1 %v134_v35 }
  0xd4   :  { %296 = vmatpush3.bf16.msra.mxu1 %v134_v35 }
  0xd5   :  { %297 = vmatprep.subr.bf16.mxu1 %v133_v36 }
  0xd8   :  { %298 = vmatpush3.bf16.msra.mxu1 %v133_v36 }
  0xdb   :  { %300 = vmatmul.mubr.msk.bf16.vlgmr.msra.gmra.mxu1 %vm169_vm1, %v309_v37 }
 0x19b   :  { %v301_v41 = vpop.f32.mrf.mxu1 }
 0x19c   :  { %v219_v46 = vadd.f32 %v301_v41, %v152_v40 }
 0x19d   :  { %v210_v43 = vpop.f32.mrf.mxu1 }
 0x19e   :  { %v211_v44 = vadd.f32 %v210_v43, %v142_v38  ;;  %v227_v53 = vmax.f32 %v219_v46, 0.0 }
 0x19f   :  { %v302_v45 = vpop.f32.mrf.mxu1 }
 0x1a0   :  { %v225_v49 = vmax.f32 %v211_v44, 0.0  ;;  %v222_v50 = vadd.f32 %v302_v45, %v157_v42  ;;  %v255_v59 = vmul.f32 %v246_v58, %v227_v53 }
 0x1a1   :  { %v213_v48 = vpop.f32.mrf.mxu1 }
 0x1a2   :  { %v214_v51 = vadd.f32 %v213_v48, %v147_v39  ;;  %v253_v55 = vmul.f32 %v236_v47, %v225_v49  ;;  %v228_v56 = vmax.f32 %v222_v50, 0.0 }
 0x1a4   :  { %v226_v54 = vmax.f32 %v214_v51, 0.0  ;;  %v256_v62 = vmul.f32 %v251_v61, %v228_v56 }
 0x1a6   :  { %v254_v57 = vmul.f32 %v241_v52, %v226_v54 }
 0x1a8   :  { %v257_v60 = vadd.f32 %v254_v57, %v253_v55 }
 0x1aa   :  { %v258_v63 = vadd.f32 %v257_v60, %v255_v59 }
 0x1ac   :  { %v259_v0 = vadd.f32 %v258_v63, %v256_v62 }
 0x1ae   :  { %v260_v1 = vrot.slane %v259_v0, 4 }
 0x1b0   :  { %v261_v2 = vadd.f32 %v260_v1, %v259_v0 }
 0x1b2   :  { %v262_v3 = vrot.slane %v261_v2, 2 }
 0x1b4   :  { %v263_v4 = vadd.f32 %v262_v3, %v261_v2 }
 0x1b6   :  { %v264_v5 = vrot.slane %v263_v4, 1 }
 0x1b8   :  { %v265_v7 = vadd.f32 %v264_v5, %v263_v4 }
 0x1ba   :  { %v268_v8 = vadd.f32 %v267_v6, %v265_v7 }
 0x1bc   :  { %269 = vst [vmem:[%s422_s7] sm:$0x1] %v268_v8 }

</bundles_post_ra>
